<compile_context>
chip_gen: v5e
topology: v5e:2x2
jax: 0.10.0
libtpu: 0.0.40
codegen_flags: <defaults>
</compile_context>

<pallas_src>
import jax
import jax.numpy as jnp
from jax.experimental import pallas as pl
from jax.experimental.pallas import tpu as pltpu


def mlp_head_kernel(x_ref, w1_ref, b1_ref, w2_ref, b2_ref, w3_ref, b3_ref,
                    o_ref):
    """Fused 3-layer MLP for one batch tile.

    MXU operands are fed in the stored weight dtype (bf16 by default: ~2x MXU
    throughput on v6e/v7x and half the weight DMA bytes) with f32 accumulation.
    Bias-add and ReLU stay in f32 (v5e VPU/EUP have no bf16).
    """
    cd = w1_ref.dtype  # compute dtype for MXU operands (bf16 by default)

    x = x_ref[...]
    if x.dtype != cd:          # no forced f32 upcast; bf16 inputs stay bf16
        x = x.astype(cd)

    h = jnp.dot(x, w1_ref[...], preferred_element_type=jnp.float32)
    h = jnp.maximum(h + b1_ref[...].astype(jnp.float32), 0.0)

    h = jnp.dot(h.astype(cd), w2_ref[...], preferred_element_type=jnp.float32)
    h = jnp.maximum(h + b2_ref[...].astype(jnp.float32), 0.0)

    h = jnp.dot(h.astype(cd), w3_ref[...], preferred_element_type=jnp.float32)
    h = h + b3_ref[...].astype(jnp.float32)

    o_ref[...] = h.astype(o_ref.dtype)


def _pick_block_b(B):
    """Batch tile size.

    Small B: one full-extent step (per-step overhead ~0.35us dominates;
    splitting only adds steps). Large B: 256-1024 rows/step so DMA pipelining
    approaches the HBM roofline, with >= 2 steps so both v7x TensorCores get
    work on the 'parallel' batch axis.
    """
    if B < 512:
        return B
    for cand in (1024, 512, 256):
        if B % cand == 0 and B // cand >= 2:
            return cand
    # Fallback: largest multiple-of-8 divisor of B that gives >= 2 steps.
    best = B
    for cand in range(8, B // 2 + 1, 8):
        if B % cand == 0:
            best = cand
    return best


def _forward_impl(x, params, block_b, single_buffer):
    B, input_dim = x.shape
    hidden_dim = params["w1"].shape[1]
    half_hidden = params["w2"].shape[1]
    n_classes = params["w3"].shape[1]
    num_steps = B // block_b

    def replicated(shape):
        idx_map = lambda i: (0,) * len(shape)
        if single_buffer:
            # Weights/biases never change across grid steps; a single VMEM
            # buffer (instead of the default 2) halves their footprint.
            return pl.BlockSpec(shape, idx_map, pipeline_mode=pl.Buffered(1))
        return pl.BlockSpec(shape, idx_map)

    in_specs = [
        pl.BlockSpec((block_b, input_dim), lambda i: (i, 0)),
        replicated((input_dim, hidden_dim)),
        replicated((1, hidden_dim)),
        replicated((hidden_dim, half_hidden)),
        replicated((1, half_hidden)),
        replicated((half_hidden, n_classes)),
        replicated((1, n_classes)),
    ]
    out_specs = pl.BlockSpec((block_b, n_classes), lambda i: (i, 0))

    # Advisory cost estimate so XLA schedules neighbouring ops around this
    # (potentially tiny) custom call instead of serializing on it.
    flops = 2 * B * (input_dim * hidden_dim
                     + hidden_dim * half_hidden
                     + half_hidden * n_classes)
    w_bytes = sum(int(params[k].size) * params[k].dtype.itemsize
                  for k in ("w1", "b1", "w2", "b2", "w3", "b3"))
    bytes_accessed = (int(x.size) * x.dtype.itemsize + w_bytes
                      + B * n_classes * x.dtype.itemsize)
    cost = pl.CostEstimate(flops=flops, transcendentals=0,
                           bytes_accessed=bytes_accessed)

    # VMEM budget: replicated weights (1 or 2 buffers), double-buffered x/out
    # tiles, plus f32 intermediates. Only raise the scoped limit above the
    # 32 MiB default when needed; cap with headroom below physical VMEM.
    weight_bufs = 1 if single_buffer else 2
    tile_bytes = 2 * block_b * (input_dim + n_classes) * x.dtype.itemsize
    act_bytes = 4 * block_b * (hidden_dim + half_hidden + n_classes)
    vmem_needed = weight_bufs * w_bytes + tile_bytes + act_bytes
    cp_kwargs = dict(dimension_semantics=("parallel",))
    if vmem_needed > 32 * 1024 * 1024:
        cp_kwargs["vmem_limit_bytes"] = int(min(vmem_needed * 1.25,
                                                100 * 1024 * 1024))

    return pl.pallas_call(
        mlp_head_kernel,
        out_shape=jax.ShapeDtypeStruct((B, n_classes), x.dtype),
        grid=(num_steps,),
        in_specs=in_specs,
        out_specs=out_specs,
        compiler_params=pltpu.CompilerParams(**cp_kwargs),
        cost_estimate=cost,
    )(x, params["w1"], params["b1"], params["w2"], params["b2"],
      params["w3"], params["b3"])


def model_head_forward(x, params, *, block_b=None, single_buffer_weights=None):
    """ModelHead forward: x[B, input_dim] -> logits[B, n_classes]."""
    B = x.shape[0]
    if block_b is None:
        block_b = _pick_block_b(B)
    assert B % block_b == 0, "block_b must divide the batch"
    num_steps = B // block_b
    if single_buffer_weights is None:
        single_buffer_weights = num_steps > 1  # irrelevant for grid=(1,)

    if single_buffer_weights and hasattr(pl, "Buffered"):
        try:
            return _forward_impl(x, params, block_b, single_buffer=True)
        except Exception:
            pass  # fall back to default double-buffered weight specs
    return _forward_impl(x, params, block_b, single_buffer=False)


def init_params(key, input_dim, hidden_dim, n_classes, *,
                weight_dtype=jnp.bfloat16):
    """PyTorch-style uniform init; weights stored bf16 at rest, biases f32."""
    half = hidden_dim // 2
    ks = jax.random.split(key, 6)

    def lin(kw, kb, fan_in, fan_out):
        bound = 1.0 / jnp.sqrt(fan_in)
        w = jax.random.uniform(kw, (fan_in, fan_out), jnp.float32,
                               -bound, bound)
        b = jax.random.uniform(kb, (1, fan_out), jnp.float32, -bound, bound)
        return w.astype(weight_dtype), b

    w1, b1 = lin(ks[0], ks[1], input_dim, hidden_dim)
    w2, b2 = lin(ks[2], ks[3], hidden_dim, half)
    w3, b3 = lin(ks[4], ks[5], half, n_classes)
    return dict(w1=w1, b1=b1, w2=w2, b2=b2, w3=w3, b3=b3)


def reference_forward(x, p):
    """Pure-JAX reference emulating the kernel's mixed precision exactly."""
    cd = p["w1"].dtype

    def lin(a, w, b):
        y = jnp.dot(a.astype(cd), w, preferred_element_type=jnp.float32)
        return y + b.astype(jnp.float32)

    h = jnp.maximum(lin(x, p["w1"], p["b1"]), 0.0)
    h = jnp.maximum(lin(h, p["w2"], p["b2"]), 0.0)
    return lin(h, p["w3"], p["b3"])


def full_precision_reference(x, p):
    """f32 module semantics (loose-tolerance sanity check for bf16 weights)."""
    h = jnp.maximum(x @ p["w1"].astype(jnp.float32) + p["b1"], 0.0)
    h = jnp.maximum(h @ p["w2"].astype(jnp.float32) + p["b2"], 0.0)
    return h @ p["w3"].astype(jnp.float32) + p["b3"]


if __name__ == "__main__":
    key = jax.random.PRNGKey(0)
    k_x1, k_x2, k_p = jax.random.split(key, 3)

    # Small shapes consistent with the module: batch=8, input_dim=32,
    # hidden_dim=32 (-> hidden//2 = 16), n_classes=8.
    B, input_dim, hidden_dim, n_classes = 8, 32, 32, 8
    params = init_params(k_p, input_dim, hidden_dim, n_classes)

    # 1) Single-step grid (whole batch in one tile).
    x1 = jax.random.normal(k_x1, (B, input_dim), jnp.float32)
    out1 = jax.block_until_ready(model_head_forward(x1, params))
    assert out1.shape == (B, n_classes)
    assert jnp.allclose(out1, reference_forward(x1, params),
                        atol=1e-3, rtol=1e-3)
    assert jnp.allclose(out1, full_precision_reference(x1, params),
                        atol=1e-1, rtol=1e-1)

    # 2) Multi-step grid over the batch: exercises sublane-aligned tiling,
    #    the "parallel" batch axis (v7x megacore) and single-buffered weights.
    B2 = 16
    x2 = jax.random.normal(k_x2, (B2, input_dim), jnp.float32)
    out2 = jax.block_until_ready(model_head_forward(x2, params, block_b=8))
    assert out2.shape == (B2, n_classes)
    assert jnp.allclose(out2, reference_forward(x2, params),
                        atol=1e-3, rtol=1e-3)

    print("KERNEL_OK")
</pallas_src>

<mosaic_0001>
module attributes {stable_mosaic.version = 11 : i64} {
  func.func @mlp_head_kernel(%arg0: i32, %arg1: memref<8x32xf32, #tpu.memory_space<vmem>>, %arg2: memref<32x32xbf16, #tpu.memory_space<vmem>>, %arg3: memref<1x32xf32, #tpu.memory_space<vmem>>, %arg4: memref<32x16xbf16, #tpu.memory_space<vmem>>, %arg5: memref<1x16xf32, #tpu.memory_space<vmem>>, %arg6: memref<16x8xbf16, #tpu.memory_space<vmem>>, %arg7: memref<1x8xf32, #tpu.memory_space<vmem>>, %arg8: memref<8x8xf32, #tpu.memory_space<vmem>>) attributes {dimension_semantics = [#tpu.dimension_semantics<parallel>], iteration_bounds = array<i64: 1>, scalar_prefetch = 0 : i64, scratch_operands = 0 : i64, tpu.core_type = #tpu.core_type<tc>, window_params = [{transform_indices = @transform_0, window_bounds = array<i64: 8, 32>}, {pipeline_mode = #tpu.pipeline_mode<synchronous>, transform_indices = @transform_1, window_bounds = array<i64: 32, 32>}, {pipeline_mode = #tpu.pipeline_mode<synchronous>, transform_indices = @transform_2, window_bounds = array<i64: 1, 32>}, {pipeline_mode = #tpu.pipeline_mode<synchronous>, transform_indices = @transform_3, window_bounds = array<i64: 32, 16>}, {pipeline_mode = #tpu.pipeline_mode<synchronous>, transform_indices = @transform_4, window_bounds = array<i64: 1, 16>}, {pipeline_mode = #tpu.pipeline_mode<synchronous>, transform_indices = @transform_5, window_bounds = array<i64: 16, 8>}, {pipeline_mode = #tpu.pipeline_mode<synchronous>, transform_indices = @transform_6, window_bounds = array<i64: 1, 8>}, {transform_indices = @transform_7, window_bounds = array<i64: 8, 8>}]} {
    %c0 = arith.constant 0 : index
    %c0_0 = arith.constant 0 : index
    %0 = vector.load %arg1[%c0, %c0_0] : memref<8x32xf32, #tpu.memory_space<vmem>>, vector<8x32xf32>
    %1 = arith.truncf %0 : vector<8x32xf32> to vector<8x32xbf16>
    %c0_1 = arith.constant 0 : index
    %c0_2 = arith.constant 0 : index
    %2 = vector.load %arg2[%c0_1, %c0_2] : memref<32x32xbf16, #tpu.memory_space<vmem>>, vector<32x32xbf16>
    %cst = arith.constant dense<0.000000e+00> : vector<8x32xf32>
    %3 = tpu.matmul %1, %2, %cst {dimension_numbers = #tpu.dot_dimension_numbers<[1], [0], [0], [1], [0, 0, 1, 1], [], []>} : vector<8x32xbf16>, vector<32x32xbf16>, vector<8x32xf32> -> vector<8x32xf32>
    %c0_3 = arith.constant 0 : index
    %c0_4 = arith.constant 0 : index
    %4 = vector.load %arg3[%c0_3, %c0_4] : memref<1x32xf32, #tpu.memory_space<vmem>>, vector<1x32xf32>
    %5 = vector.broadcast %4 : vector<1x32xf32> to vector<8x32xf32>
    %6 = arith.addf %3, %5 : vector<8x32xf32>
    %cst_5 = arith.constant 0.000000e+00 : f32
    %7 = vector.broadcast %cst_5 : f32 to vector<8x32xf32>
    %8 = arith.maximumf %6, %7 : vector<8x32xf32>
    %9 = arith.truncf %8 : vector<8x32xf32> to vector<8x32xbf16>
    %c0_6 = arith.constant 0 : index
    %c0_7 = arith.constant 0 : index
    %10 = vector.load %arg4[%c0_6, %c0_7] : memref<32x16xbf16, #tpu.memory_space<vmem>>, vector<32x16xbf16>
    %cst_8 = arith.constant dense<0.000000e+00> : vector<8x16xf32>
    %11 = tpu.matmul %9, %10, %cst_8 {dimension_numbers = #tpu.dot_dimension_numbers<[1], [0], [0], [1], [0, 0, 1, 1], [], []>} : vector<8x32xbf16>, vector<32x16xbf16>, vector<8x16xf32> -> vector<8x16xf32>
    %c0_9 = arith.constant 0 : index
    %c0_10 = arith.constant 0 : index
    %12 = vector.load %arg5[%c0_9, %c0_10] : memref<1x16xf32, #tpu.memory_space<vmem>>, vector<1x16xf32>
    %13 = vector.broadcast %12 : vector<1x16xf32> to vector<8x16xf32>
    %14 = arith.addf %11, %13 : vector<8x16xf32>
    %cst_11 = arith.constant 0.000000e+00 : f32
    %15 = vector.broadcast %cst_11 : f32 to vector<8x16xf32>
    %16 = arith.maximumf %14, %15 : vector<8x16xf32>
    %17 = arith.truncf %16 : vector<8x16xf32> to vector<8x16xbf16>
    %c0_12 = arith.constant 0 : index
    %c0_13 = arith.constant 0 : index
    %18 = vector.load %arg6[%c0_12, %c0_13] : memref<16x8xbf16, #tpu.memory_space<vmem>>, vector<16x8xbf16>
    %cst_14 = arith.constant dense<0.000000e+00> : vector<8x8xf32>
    %19 = tpu.matmul %17, %18, %cst_14 {dimension_numbers = #tpu.dot_dimension_numbers<[1], [0], [0], [1], [0, 0, 1, 1], [], []>} : vector<8x16xbf16>, vector<16x8xbf16>, vector<8x8xf32> -> vector<8x8xf32>
    %c0_15 = arith.constant 0 : index
    %c0_16 = arith.constant 0 : index
    %20 = vector.load %arg7[%c0_15, %c0_16] : memref<1x8xf32, #tpu.memory_space<vmem>>, vector<1x8xf32>
    %21 = vector.broadcast %20 : vector<1x8xf32> to vector<8x8xf32>
    %22 = arith.addf %19, %21 : vector<8x8xf32>
    %c0_17 = arith.constant 0 : index
    %c0_18 = arith.constant 0 : index
    %23 = vector.load %arg8[%c0_17, %c0_18] : memref<8x8xf32, #tpu.memory_space<vmem>>, vector<8x8xf32>
    tpu.vector_store %arg8[%c0_17, %c0_18], %22 {strides = array<i32>} : memref<8x8xf32, #tpu.memory_space<vmem>>, vector<8x8xf32>,
    return
  }
  func.func @transform_0(%arg0: i32) -> (i32, i32) {
    %c0_i32 = arith.constant 0 : i32
    %c0_i32_0 = arith.constant 0 : i32
    return %arg0, %c0_i32 : i32, i32
  }
  func.func @transform_1(%arg0: i32) -> (i32, i32) {
    %c0_i32 = arith.constant 0 : i32
    %c0_i32_0 = arith.constant 0 : i32
    %c0_i32_1 = arith.constant 0 : i32
    return %c0_i32, %c0_i32_0 : i32, i32
  }
  func.func @transform_2(%arg0: i32) -> (i32, i32) {
    %c0_i32 = arith.constant 0 : i32
    %c0_i32_0 = arith.constant 0 : i32
    %c0_i32_1 = arith.constant 0 : i32
    return %c0_i32, %c0_i32_0 : i32, i32
  }
  func.func @transform_3(%arg0: i32) -> (i32, i32) {
    %c0_i32 = arith.constant 0 : i32
    %c0_i32_0 = arith.constant 0 : i32
    %c0_i32_1 = arith.constant 0 : i32
    return %c0_i32, %c0_i32_0 : i32, i32
  }
  func.func @transform_4(%arg0: i32) -> (i32, i32) {
    %c0_i32 = arith.constant 0 : i32
    %c0_i32_0 = arith.constant 0 : i32
    %c0_i32_1 = arith.constant 0 : i32
    return %c0_i32, %c0_i32_0 : i32, i32
  }
  func.func @transform_5(%arg0: i32) -> (i32, i32) {
    %c0_i32 = arith.constant 0 : i32
    %c0_i32_0 = arith.constant 0 : i32
    %c0_i32_1 = arith.constant 0 : i32
    return %c0_i32, %c0_i32_0 : i32, i32
  }
  func.func @transform_6(%arg0: i32) -> (i32, i32) {
    %c0_i32 = arith.constant 0 : i32
    %c0_i32_0 = arith.constant 0 : i32
    %c0_i32_1 = arith.constant 0 : i32
    return %c0_i32, %c0_i32_0 : i32, i32
  }
  func.func @transform_7(%arg0: i32) -> (i32, i32) {
    %c0_i32 = arith.constant 0 : i32
    %c0_i32_0 = arith.constant 0 : i32
    return %arg0, %c0_i32 : i32, i32
  }
}

</mosaic_0001>

<bundles_post_ra>
// kernel: tpu_custom_call.1
= control target key start
LH: loop header
LB: loop body
LE: loop exit
PB: predicated region body
PF: predicated region fallthrough
CT: control target
= control target key end

     0   :  { %s283_s0 = inlined_call_operand.vmem [shape: f32[8,32], index: 0, kind: input, shape index: {}]   ;;  %s284_s1 = inlined_call_operand.vmem [shape: bf16[32,32], index: 1, kind: input, shape index: {}]   ;;  %s285_s2 = inlined_call_operand.vmem [shape: f32[1,32], index: 2, kind: input, shape index: {}]   ;;  %s286_s3 = inlined_call_operand.vmem [shape: bf16[32,16], index: 3, kind: input, shape index: {}]   ;;  %s287_s4 = inlined_call_operand.vmem [shape: f32[1,16], index: 4, kind: input, shape index: {}]   ;;  %s288_s5 = inlined_call_operand.vmem [shape: bf16[16,8], index: 5, kind: input, shape index: {}]   ;;  %s289_s6 = inlined_call_operand.vmem [shape: f32[1,8], index: 6, kind: input, shape index: {}]   ;;  %s290_s7 = inlined_call_operand.hbm [shape: f32[8,8], index: 7, kind: output, shape index: {}]  }
   0x1   :  { %v178_v0 = vld [vmem:[%s284_s1 + $0x8] sm:$0xff]  ;;  %v177_v1 = vld [vmem:[%s284_s1] sm:$0xff] }
   0x2   :  { %60 = vmatpush.bf16.msra.mxu0 %v178_v0  ;;  %v28_v2 = vld [vmem:[%s283_s0] sm:$0xff] }
   0x3   :  { %12 = vsyncpa [#allocation3], 0  ;;  %v29_v3 = vpack.c.bf16 %v28_v2, %v28_v2  ;;  %vm50_vm0 = vcmask 261120   ;;  %v180_v4 = vld [vmem:[%s286_s3 + $0x8] sm:$0xff]  ;;  %v179_v5 = vld [vmem:[%s286_s3] sm:$0xff]  ;;  %vm119_vm1 = vcmask 130048  }
   0x4   :  { %98 = vmatpush.bf16.msra.mxu1 %v180_v4  ;;  %v183_v6 = vld [vmem:[%s285_s2] ss:$0 sm:$0xff]  ;;  %s212_s15 = smov [#allocation2]   ;;  %s145_s18 = sshll.u32 %s290_s7, 4  ;;  %vm136_vm2 = vcmask 64512   ;;  %s146_s18 = int_to_ptr.hbm [resolvable:$true] %s145_s18 }
   0x5   :  { %v181_v12 = vld [vmem:[%s288_s5] sm:$0xff]  ;;  %s143_s16 = sshll.u32 %s212_s15, 4  ;;  %s144_s16 = int_to_ptr.vmem [resolvable:$true] %s143_s16 }
   0x6   :  { %61 = vmatpush.bf16.msra.mxu0 %v177_v1  ;;  %130 = vmatpush.bf16.msra.mxu2 %v181_v12  ;;  %v184_v13 = vld [vmem:[%s287_s4] ss:$0 sm:$0xff] }
   0x7   :  { %v185_v19 = vld [vmem:[%s289_s6] ss:$0 sm:$0xff] }
   0x8   :  { %99 = vmatpush.bf16.msra.mxu1 %v179_v5 }
   0x9   :  { %162 = vmatmul.msk.bf16.vlgmr.msra.gmra.mxu0 %vm50_vm0, %v29_v3 }
  0x86   :  { %v63_v7 = vpop.f32.mrf.mxu0 }
  0x87   :  { %v64_v8 = vadd.f32 %v183_v6, %v63_v7 }
  0x89   :  { %v67_v9 = vmax.f32 %v64_v8, 0.0 }
  0x8b   :  { %v68_v10 = vpack.c.bf16 %v67_v9, %v67_v9 }
  0x8d   :  { %171 = vmatmul.msk.bf16.vlgmr.msra.gmra.mxu1 %vm50_vm0, %v68_v10 }
  0x8e   :  { %v65_v11 = vpop.f32.mrf.mxu0 }
 0x10a   :  { %v101_v14 = vpop.f32.mrf.mxu1 }
 0x10b   :  { %v102_v15 = vadd.f32 %v184_v13, %v101_v14 }
 0x10d   :  { %v105_v16 = vmax.f32 %v102_v15, 0.0 }
 0x10f   :  { %v106_v17 = vpack.c.bf16 %v105_v16, %v105_v16 }
 0x111   :  { %176 = vmatmul.msk.bf16.vlgmr.msra.gmra.mxu2 %vm119_vm1, %v106_v17 }
 0x112   :  { %v103_v18 = vpop.f32.mrf.mxu1 }
 0x194   :  { %v132_v20 = vpop.f32.mrf.mxu2 }
 0x195   :  { %v133_v21 = vadd.f32 %v185_v19, %v132_v20 }
 0x197   :  { %137 = vst.msk [vmem:[#allocation2] sm:$0xff] %vm136_vm2, %v133_v21 }
 0x198   :  { %148 = dma.vmem_to_hbm [thread:$0]  %s144_s16, 128, %s146_s18, [#allocation3]  }
 0x19c   :  { %v134_v22 = vpop.f32.mrf.mxu2 }
 0x19d   :  { %210 = dma.done.wait [#allocation3], 128  }
 0x19e   :  { %211 = vsyncadd [#allocation3], 4294967168 }
 0x19f   :  { %153 = vsyncpa [#allocation3], 1 }

</bundles_post_ra>
